<compile_context>
chip_gen: v5e
topology: v5e:2x2
jax: 0.10.0
libtpu: 0.0.40
codegen_flags: <defaults>
</compile_context>

<pallas_src>
import jax
import jax.numpy as jnp
from jax.experimental import pallas as pl
from jax.experimental.pallas import tpu as pltpu

_LANE = 1024     # lane-dense last dim, multiple of 128
_ROWS = 512      # rows per block -> 512*1024*4B = 2 MiB f32 blocks


def _make_add_bias_kernel(bias):
    def add_bias_kernel(x_ref, o_ref):
        # bias is a trace-time constant; weak typing keeps the compute dtype
        # equal to the input dtype for floating inputs.
        o_ref[...] = (x_ref[...] + bias).astype(o_ref.dtype)
    return add_bias_kernel


def add_bias(x: jax.Array, bias=0) -> jax.Array:
    orig_shape = x.shape
    orig_dtype = x.dtype
    total = x.size
    if total == 0:
        return x

    # Lane-dense 2D view: (R, _LANE), with the tail padded.
    num_rows = pl.cdiv(total, _LANE)
    # Block rows: multiple of 8 sublanes, capped at _ROWS.
    tm = min(_ROWS, ((num_rows + 7) // 8) * 8)
    rows_padded = ((num_rows + tm - 1) // tm) * tm
    padded_total = rows_padded * _LANE

    flat = x.reshape(-1)
    if padded_total != total:
        flat = jnp.pad(flat, (0, padded_total - total))
    x2d = flat.reshape(rows_padded, _LANE)

    grid = (rows_padded // tm,)

    out = pl.pallas_call(
        _make_add_bias_kernel(bias),
        out_shape=jax.ShapeDtypeStruct((rows_padded, _LANE), orig_dtype),
        grid=grid,
        in_specs=[pl.BlockSpec((tm, _LANE), lambda i: (i, 0))],
        out_specs=pl.BlockSpec((tm, _LANE), lambda i: (i, 0)),
        compiler_params=pltpu.CompilerParams(
            dimension_semantics=("parallel",),
        ),
    )(x2d)

    return out.reshape(-1)[:total].reshape(orig_shape)


class AddBias:
    """JAX/Pallas equivalent of the PyTorch AddBias module (y = x + bias)."""

    def __init__(self, bias=0):
        self.bias = bias

    def __call__(self, x):
        return add_bias(x, self.bias)


if __name__ == "__main__":
    key = jax.random.PRNGKey(0)

    # NCHW input, consistent with the PyTorch conv-style usage.
    x = jax.random.normal(key, (2, 4, 16, 16), dtype=jnp.float32)
    bias = 0.5
    module = AddBias(bias=bias)

    y = module(x)
    y = jax.block_until_ready(y)
    ref = x + bias
    assert y.shape == x.shape and y.dtype == x.dtype
    assert jnp.allclose(y, ref, atol=1e-6, rtol=1e-6)

    # Second check: odd-sized tensor to exercise the padding/trim path.
    key2 = jax.random.PRNGKey(1)
    x2 = jax.random.normal(key2, (3, 5, 7), dtype=jnp.float32)
    y2 = jax.block_until_ready(AddBias(bias=-1.25)(x2))
    ref2 = x2 - 1.25
    assert y2.shape == x2.shape and y2.dtype == x2.dtype
    assert jnp.allclose(y2, ref2, atol=1e-6, rtol=1e-6)

    print("KERNEL_OK")
</pallas_src>

<mosaic_0001>
module attributes {stable_mosaic.version = 11 : i64} {
  func.func @add_bias_kernel(%arg0: i32, %arg1: memref<8x1024xf32, #tpu.memory_space<vmem>>, %arg2: memref<8x1024xf32, #tpu.memory_space<vmem>>) attributes {dimension_semantics = [#tpu.dimension_semantics<parallel>], iteration_bounds = array<i64: 1>, scalar_prefetch = 0 : i64, scratch_operands = 0 : i64, tpu.core_type = #tpu.core_type<tc>, window_params = [{transform_indices = @transform_0, window_bounds = array<i64: 8, 1024>}, {transform_indices = @transform_1, window_bounds = array<i64: 8, 1024>}]} {
    %c0 = arith.constant 0 : index
    %c0_0 = arith.constant 0 : index
    %0 = vector.load %arg1[%c0, %c0_0] : memref<8x1024xf32, #tpu.memory_space<vmem>>, vector<8x1024xf32>
    %cst = arith.constant 5.000000e-01 : f32
    %1 = vector.broadcast %cst : f32 to vector<8x1024xf32>
    %2 = arith.addf %0, %1 : vector<8x1024xf32>
    %c0_1 = arith.constant 0 : index
    %c0_2 = arith.constant 0 : index
    %3 = vector.load %arg2[%c0_1, %c0_2] : memref<8x1024xf32, #tpu.memory_space<vmem>>, vector<8x1024xf32>
    tpu.vector_store %arg2[%c0_1, %c0_2], %2 {strides = array<i32>} : memref<8x1024xf32, #tpu.memory_space<vmem>>, vector<8x1024xf32>,
    return
  }
  func.func @transform_0(%arg0: i32) -> (i32, i32) {
    %c0_i32 = arith.constant 0 : i32
    %c0_i32_0 = arith.constant 0 : i32
    return %arg0, %c0_i32 : i32, i32
  }
  func.func @transform_1(%arg0: i32) -> (i32, i32) {
    %c0_i32 = arith.constant 0 : i32
    %c0_i32_0 = arith.constant 0 : i32
    return %arg0, %c0_i32 : i32, i32
  }
}

</mosaic_0001>

<bundles_post_ra>
// kernel: tpu_custom_call.1
= control target key start
LH: loop header
LB: loop body
LE: loop exit
PB: predicated region body
PF: predicated region fallthrough
CT: control target
= control target key end

     0   :  { %6 = vsyncpa [#allocation3], 0  ;;  %s136_s0 = inlined_call_operand.hbm [shape: f32[8,1024], index: 0, kind: input, shape index: {}]   ;;  %s137_s1 = inlined_call_operand.hbm [shape: f32[8,1024], index: 1, kind: output, shape index: {}]  }
   0x1   :  { %7 = vsyncpa [#allocation4], 0  ;;  %s13_s8 = sshll.u32 %s136_s0, 4  ;;  %s118_s9 = smov [#allocation2]   ;;  %s14_s8 = int_to_ptr.hbm [resolvable:$true] %s13_s8 }
   0x2   :  { %s15_s10 = sshll.u32 %s118_s9, 4  ;;  %s16_s10 = int_to_ptr.vmem [resolvable:$true] %s15_s10 }
   0x3   :  { %18 = dma.hbm_to_vmem [thread:$0]  %s14_s8, 1024, %s16_s10, [#allocation3]  }
   0x4   :  { %114 = dma.done.wait [#allocation3], 1024  }
   0x5   :  { %115 = vsyncadd [#allocation3], 4294966272  ;;  %v23_v0 = vld [vmem:[#allocation2] sm:$0xff]  ;;  %v24_v1 = vld [vmem:[#allocation2 + $0x8] sm:$0xff]  ;;  %s119_s0 = smov [#allocation5]   ;;  %s54_s14 = sshll.u32 %s137_s1, 4  ;;  %s55_s14 = int_to_ptr.hbm [resolvable:$true] %s54_s14 }
   0x6   :  { %v25_v2 = vld [vmem:[#allocation2 + $0x10] sm:$0xff]  ;;  %v31_v3 = vadd.f32 0.5, %v23_v0  ;;  %v32_v4 = vadd.f32 0.5, %v24_v1  ;;  %v26_v6 = vld [vmem:[#allocation2 + $0x18] sm:$0xff]  ;;  %v27_v7 = vld [vmem:[#allocation2 + $0x20] sm:$0xff]  ;;  %s52_s11 = sshll.u32 %s119_s0, 4  ;;  %s53_s11 = int_to_ptr.vmem [resolvable:$true] %s52_s11 }
   0x7   :  { %v33_v5 = vadd.f32 0.5, %v25_v2  ;;  %v28_v8 = vld [vmem:[#allocation2 + $0x28] sm:$0xff]  ;;  %v34_v9 = vadd.f32 0.5, %v26_v6  ;;  %v29_v10 = vld [vmem:[#allocation2 + $0x30] sm:$0xff]  ;;  %v35_v11 = vadd.f32 0.5, %v27_v7  ;;  %v30_v12 = vld [vmem:[#allocation2 + $0x38] sm:$0xff] }
   0x8   :  { %39 = vst [vmem:[#allocation5] sm:$0xff] %v31_v3  ;;  %v36_v13 = vadd.f32 0.5, %v28_v8  ;;  %v37_v14 = vadd.f32 0.5, %v29_v10  ;;  %v38_v15 = vadd.f32 0.5, %v30_v12 }
   0x9   :  { %40 = vst [vmem:[#allocation5 + $0x8] sm:$0xff] %v32_v4 }
   0xa   :  { %41 = vst [vmem:[#allocation5 + $0x10] sm:$0xff] %v33_v5 }
   0xb   :  { %42 = vst [vmem:[#allocation5 + $0x18] sm:$0xff] %v34_v9 }
   0xc   :  { %43 = vst [vmem:[#allocation5 + $0x20] sm:$0xff] %v35_v11 }
   0xd   :  { %44 = vst [vmem:[#allocation5 + $0x28] sm:$0xff] %v36_v13 }
   0xe   :  { %45 = vst [vmem:[#allocation5 + $0x30] sm:$0xff] %v37_v14 }
   0xf   :  { %46 = vst [vmem:[#allocation5 + $0x38] sm:$0xff] %v38_v15 }
  0x10   :  { %57 = dma.vmem_to_hbm [thread:$0]  %s53_s11, 1024, %s55_s14, [#allocation4]  }
  0x11   :  { %116 = dma.done.wait [#allocation4], 1024  }
  0x12   :  { %117 = vsyncadd [#allocation4], 4294966272 }
  0x13   :  { %62 = vsyncpa [#allocation3], 1 }
  0x14   :  { %63 = vsyncpa [#allocation4], 1 }

</bundles_post_ra>
